<compile_context>
chip_gen: v7x
topology: tpu7x:2x2x1
jax: 0.10.0
libtpu: 0.0.40
codegen_flags: <defaults>
</compile_context>

<pallas_src>
import functools

import jax
import jax.numpy as jnp
from jax import lax
from jax.experimental import pallas as pl
from jax.experimental.pallas import tpu as pltpu


class Param:
    def __init__(self, xPixel, yPixel, time_frame, ref):
        self.pixel_length = xPixel * yPixel
        self.water2Camera = 20
        self.camera2Sensor = 1
        self.ylength = 10
        self.scale = 2
        self.ref = ref
        self.pixel_size = self.ylength / yPixel / self.water2Camera
        self.refra_index = 1.33
        self.time_frame = time_frame
        self.camera = jnp.zeros((3, 1), jnp.float32)  # np.array([[0],[0],[0]])


def _round_up(x, m):
    return (x + m - 1) // m * m


def _proj_kernel(P_ref, I_ref, G_ref, M_ref, acc_ref, *,
                 cam0, cam1, cam2, inv_refra,
                 tile_l, tiles_per_par, valid_l, apply_mask):
    p = pl.program_id(0)          # parallel slice (both TCs on v7x)
    i = pl.program_id(1)          # reduction over L-tiles within the slice

    @pl.when(i == 0)
    def _init():
        acc_ref[...] = jnp.zeros_like(acc_ref)

    # Precomputed matvec rows: Wh = W@H, dx = W_dx@H/(ps*scale), dy likewise.
    Wh = G_ref[0:1, :]
    dx = G_ref[1:2, :]
    dy = G_ref[2:3, :]

    I0 = I_ref[0:1, :]; I1 = I_ref[1:2, :]; I2 = I_ref[2:3, :]
    # S = I * Wh
    S0 = I0 * Wh; S1 = I1 * Wh; S2 = I2 * Wh

    # e = (camera - S) / ||camera - S||  (rsqrt: EUP, no divides)
    d0 = cam0 - S0; d1 = cam1 - S1; d2 = cam2 - S2
    inv_en = lax.rsqrt(d0 * d0 + d1 * d1 + d2 * d2)
    e0 = d0 * inv_en; e1 = d1 * inv_en; e2 = d2 * inv_en

    # N = normalize([dx, dy, -I0*dx - I1*dy - Wh])
    Nz = -I0 * dx - I1 * dy - Wh
    inv_nn = lax.rsqrt(dx * dx + dy * dy + Nz * Nz)
    N0 = dx * inv_nn; N1 = dy * inv_nn; N2 = Nz * inv_nn

    # Refraction direction r. Radicand >= 1 - inv_refra^2 > 0 for real data,
    # so no clamp (matches the reference exactly).
    cosang = N0 * e0 + N1 * e1 + N2 * e2
    coef = inv_refra * cosang - jnp.sqrt(
        1.0 - inv_refra * inv_refra * (1.0 - cosang * cosang))
    r0 = coef * N0 - inv_refra * e0
    r1 = coef * N1 - inv_refra * e1
    r2 = coef * N2 - inv_refra * e2

    # contrib = M * || (P - S) - <(P - S), r> r ||^2
    P0 = P_ref[0:1, :]; P1 = P_ref[1:2, :]; P2 = P_ref[2:3, :]
    q0 = P0 - S0; q1 = P1 - S1; q2 = P2 - S2
    proj = q0 * r0 + q1 * r1 + q2 * r2
    t0 = q0 - proj * r0; t1 = q1 - proj * r1; t2 = q2 - proj * r2
    contrib = M_ref[...] * (t0 * t0 + t1 * t1 + t2 * t2)          # (1, TL)

    if apply_mask:  # emitted only when L was padded up to the tile grid
        tile = p * tiles_per_par + i
        col = tile * tile_l + lax.broadcasted_iota(jnp.int32, contrib.shape, 1)
        contrib = jnp.where(col < valid_l, contrib, 0.0)          # kills pad NaNs

    # Lane-wide partial accumulation into the resident output row (pure VPU);
    # the single cross-lane reduction happens once, outside the kernel.
    acc_ref[...] += contrib


def point_cloud_proj(param, P, H, I, N, W, W_dx, W_dy, M, *, max_tile_l=32768):
    """JAX/Pallas equivalent of pointCloudProj.forward. Returns scalar D."""
    del N  # shadowed/overwritten inside the original forward; never read.
    time_frame = param.time_frame

    I = jnp.asarray(I, jnp.float32)                      # (3, L)
    L = int(I.shape[1])

    # ---- precompute the three (torch.sparse in the original) matvecs in XLA
    # (single HBM pass over each weight matrix); the kernel streams only (3,L).
    # TODO(synk): for genuinely sparse W/W_dx/W_dy, implement a scalar-prefetch
    # gather kernel over per-ray nnz indices instead of the dense matvec.
    Hc = jnp.asarray(H, jnp.float32).reshape(-1)
    Wh = jnp.asarray(W, jnp.float32) @ Hc
    dx = (jnp.asarray(W_dx, jnp.float32) @ Hc) / param.pixel_size / param.scale
    dy = (jnp.asarray(W_dy, jnp.float32) @ Hc) / param.pixel_size / param.scale
    G = jnp.stack([Wh, dx, dy], axis=0)                            # (3, L)

    P_rep = jnp.tile(jnp.asarray(P, jnp.float32), (1, time_frame)) # (3, L)
    M_row = jnp.asarray(M, jnp.float32).reshape(1, -1)             # (1, L)

    # ---- L-axis tiling: big lane-dense tiles (kernel is HBM-streaming bound);
    # a leading "parallel" axis shards the tile range across TensorCores.
    TL = max(128, (min(int(max_tile_l), _round_up(L, 128)) // 128) * 128)
    num_tiles = -(-L // TL)
    n_par = 2 if num_tiles >= 2 else 1
    tiles_per_par = -(-num_tiles // n_par)
    L_pad = n_par * tiles_per_par * TL
    apply_mask = (L_pad != L)

    if apply_mask:
        pad = L_pad - L
        I_in = jnp.pad(I, ((0, 0), (0, pad)))
        P_rep = jnp.pad(P_rep, ((0, 0), (0, pad)))
        G = jnp.pad(G, ((0, 0), (0, pad)))
        M_row = jnp.pad(M_row, ((0, 0), (0, pad)))
    else:
        I_in = I

    cam = jnp.asarray(param.camera, jnp.float32).reshape(3)
    cam0, cam1, cam2 = float(cam[0]), float(cam[1]), float(cam[2])

    # VMEM budget: 4 double-buffered f32 inputs + resident accumulator row,
    # each block padded to 8 sublanes in VMEM.
    try:
        vmem_bytes = int(pltpu.get_tpu_info().vmem_capacity_bytes)
    except Exception:
        vmem_bytes = 64 << 20                            # conservative (v7x per-TC)
    est = (4 * 2 * 8 * TL * 4                            # P, I, G, M (double-buffered)
           + 2 * 8 * TL * 4                              # resident output accumulator
           + (2 << 20))                                  # slack: intermediates
    vmem_limit = int(min(max(32 << 20, est + (4 << 20)),
                         max(vmem_bytes - (8 << 20), 32 << 20)))

    kernel = functools.partial(
        _proj_kernel,
        cam0=cam0, cam1=cam1, cam2=cam2,
        inv_refra=float(1.0 / param.refra_index),
        tile_l=TL, tiles_per_par=tiles_per_par,
        valid_l=L, apply_mask=apply_mask)

    lane_map = lambda p, i: (0, p * tiles_per_par + i)

    partials = pl.pallas_call(
        kernel,
        out_shape=jax.ShapeDtypeStruct((n_par, TL), jnp.float32),
        grid=(n_par, tiles_per_par),
        in_specs=[
            pl.BlockSpec((3, TL), lane_map),             # P (tiled over time)
            pl.BlockSpec((3, TL), lane_map),             # I (ray directions)
            pl.BlockSpec((3, TL), lane_map),             # [Wh; dx; dy]
            pl.BlockSpec((1, TL), lane_map),             # M (mask)
        ],
        out_specs=pl.BlockSpec((1, TL), lambda p, i: (p, 0)),  # per-slice acc
        compiler_params=pltpu.CompilerParams(
            dimension_semantics=("parallel", "arbitrary"),
            vmem_limit_bytes=vmem_limit),
    )(P_rep, I_in, G, M_row)

    # Final cross-lane reduction of the per-core / per-lane partial sums.
    return jnp.sum(partials)


def _reference(param, P, H, I, W, W_dx, W_dy, M):
    """Pure-JAX f32 reference of the PyTorch forward (for validation)."""
    Hc = jnp.asarray(H, jnp.float32).reshape(-1, 1)
    Wh = (jnp.asarray(W, jnp.float32) @ Hc).reshape(1, -1)
    S = jnp.asarray(I, jnp.float32) * Wh
    cam = jnp.asarray(param.camera, jnp.float32).reshape(3, 1)
    d = cam - S
    e = d / jnp.linalg.norm(d, axis=0, keepdims=True)
    dx = (jnp.asarray(W_dx, jnp.float32) @ Hc).reshape(1, -1) / param.pixel_size / param.scale
    dy = (jnp.asarray(W_dy, jnp.float32) @ Hc).reshape(1, -1) / param.pixel_size / param.scale
    Nn = jnp.concatenate([dx, dy, -I[0:1] * dx - I[1:2] * dy - Wh], axis=0)
    Nn = Nn / jnp.linalg.norm(Nn, axis=0, keepdims=True)
    inv = 1.0 / param.refra_index
    c = jnp.sum(Nn * e, axis=0, keepdims=True)
    r = (inv * c - jnp.sqrt(1.0 - inv * inv * (1.0 - c * c))) * Nn - inv * e
    q = jnp.tile(jnp.asarray(P, jnp.float32), (1, param.time_frame)) - S
    proj = jnp.sum(q * r, axis=0, keepdims=True)
    return jnp.sum(jnp.asarray(M, jnp.float32) * (q - proj * r) ** 2)


if __name__ == "__main__":
    # Small synthetic problem consistent with the module:
    # ref image 16x16 -> 256 pixels, 3 time frames -> L = 768 rays.
    xPixel = yPixel = 16
    time_frame = 3
    param = Param(xPixel, yPixel, time_frame, ref=20)

    n_pix = xPixel * yPixel            # 256
    L = n_pix * time_frame             # 768
    K = n_pix                          # size of height field H

    key = jax.random.PRNGKey(0)
    k = jax.random.split(key, 7)
    P = jax.random.normal(k[0], (3, n_pix), jnp.float32)                    # point cloud
    H = jax.random.uniform(k[1], (yPixel, xPixel), jnp.float32, 0.5, 1.5)   # height field
    I = jax.random.normal(k[2], (3, L), jnp.float32)                        # ray directions
    N_in = jax.random.normal(k[3], (3, L), jnp.float32)                     # unused in fwd
    W = jax.random.uniform(k[4], (L, K), jnp.float32)                       # (dense) interp
    W_dx = 0.1 * jax.random.normal(k[5], (L, K), jnp.float32)
    W_dy = 0.1 * jax.random.normal(k[6], (L, K), jnp.float32)
    M = jnp.ones((1, L), jnp.float32)                                       # mask

    D_ref = jax.block_until_ready(_reference(param, P, H, I, W, W_dx, W_dy, M))

    # Exercise both paths: single large tile, and multi-tile (masked, 2-way
    # parallel axis) by forcing a small tile.
    for max_tl in (32768, 256):
        D = jax.block_until_ready(
            point_cloud_proj(param, P, H, I, N_in, W, W_dx, W_dy, M,
                             max_tile_l=max_tl))
        if not abs(float(D) - float(D_ref)) <= 1e-3 * abs(float(D_ref)) + 1e-4:
            raise AssertionError(
                f"mismatch (max_tile_l={max_tl}): kernel={float(D)} ref={float(D_ref)}")
    print("KERNEL_OK")
</pallas_src>

<mosaic_0001>
module attributes {stable_mosaic.version = 11 : i64} {
  func.func @_proj_kernel(%arg0: i32, %arg1: i32, %arg2: memref<3x768xf32, #tpu.memory_space<vmem>>, %arg3: memref<3x768xf32, #tpu.memory_space<vmem>>, %arg4: memref<3x768xf32, #tpu.memory_space<vmem>>, %arg5: memref<1x768xf32, #tpu.memory_space<vmem>>, %arg6: memref<1x768xf32, #tpu.memory_space<vmem>>) attributes {dimension_semantics = [#tpu.dimension_semantics<parallel>, #tpu.dimension_semantics<arbitrary>], iteration_bounds = array<i64: 1, 1>, scalar_prefetch = 0 : i64, scratch_operands = 0 : i64, tpu.core_type = #tpu.core_type<tc>, window_params = [{transform_indices = @transform_0, window_bounds = array<i64: 3, 768>}, {transform_indices = @transform_1, window_bounds = array<i64: 3, 768>}, {transform_indices = @transform_2, window_bounds = array<i64: 3, 768>}, {transform_indices = @transform_3, window_bounds = array<i64: 1, 768>}, {transform_indices = @transform_4, window_bounds = array<i64: 1, 768>}]} {
    %c0_i32 = arith.constant 0 : i32
    %0 = arith.cmpi eq, %arg1, %c0_i32 : i32
    %1 = arith.extui %0 : i1 to i32
    %c0_i32_0 = arith.constant 0 : i32
    %2 = arith.cmpi ne, %1, %c0_i32_0 : i32
    scf.if %2 {
      %cst_32 = arith.constant 0.000000e+00 : f32
      %97 = vector.broadcast %cst_32 : f32 to vector<1x768xf32>
      %c0_33 = arith.constant 0 : index
      %c0_34 = arith.constant 0 : index
      %98 = vector.load %arg6[%c0_33, %c0_34] : memref<1x768xf32, #tpu.memory_space<vmem>>, vector<1x768xf32>
      tpu.vector_store %arg6[%c0_33, %c0_34], %97 {strides = array<i32>} : memref<1x768xf32, #tpu.memory_space<vmem>>, vector<1x768xf32>,
    } else {
    }
    %c0 = arith.constant 0 : index
    %c0_1 = arith.constant 0 : index
    %3 = vector.load %arg4[%c0, %c0_1] : memref<3x768xf32, #tpu.memory_space<vmem>>, vector<1x768xf32>
    %c1 = arith.constant 1 : index
    %c0_2 = arith.constant 0 : index
    %4 = vector.load %arg4[%c1, %c0_2] : memref<3x768xf32, #tpu.memory_space<vmem>>, vector<1x768xf32>
    %c2 = arith.constant 2 : index
    %c0_3 = arith.constant 0 : index
    %5 = vector.load %arg4[%c2, %c0_3] : memref<3x768xf32, #tpu.memory_space<vmem>>, vector<1x768xf32>
    %c0_4 = arith.constant 0 : index
    %c0_5 = arith.constant 0 : index
    %6 = vector.load %arg3[%c0_4, %c0_5] : memref<3x768xf32, #tpu.memory_space<vmem>>, vector<1x768xf32>
    %c1_6 = arith.constant 1 : index
    %c0_7 = arith.constant 0 : index
    %7 = vector.load %arg3[%c1_6, %c0_7] : memref<3x768xf32, #tpu.memory_space<vmem>>, vector<1x768xf32>
    %c2_8 = arith.constant 2 : index
    %c0_9 = arith.constant 0 : index
    %8 = vector.load %arg3[%c2_8, %c0_9] : memref<3x768xf32, #tpu.memory_space<vmem>>, vector<1x768xf32>
    %9 = arith.mulf %6, %3 : vector<1x768xf32>
    %10 = arith.mulf %7, %3 : vector<1x768xf32>
    %11 = arith.mulf %8, %3 : vector<1x768xf32>
    %cst = arith.constant 0.000000e+00 : f32
    %12 = vector.broadcast %cst : f32 to vector<1x768xf32>
    %13 = arith.subf %12, %9 : vector<1x768xf32>
    %cst_10 = arith.constant 0.000000e+00 : f32
    %14 = vector.broadcast %cst_10 : f32 to vector<1x768xf32>
    %15 = arith.subf %14, %10 : vector<1x768xf32>
    %cst_11 = arith.constant 0.000000e+00 : f32
    %16 = vector.broadcast %cst_11 : f32 to vector<1x768xf32>
    %17 = arith.subf %16, %11 : vector<1x768xf32>
    %18 = arith.mulf %13, %13 : vector<1x768xf32>
    %19 = arith.mulf %15, %15 : vector<1x768xf32>
    %20 = arith.addf %18, %19 : vector<1x768xf32>
    %21 = arith.mulf %17, %17 : vector<1x768xf32>
    %22 = arith.addf %20, %21 : vector<1x768xf32>
    %23 = math.rsqrt %22 : vector<1x768xf32>
    %24 = arith.mulf %13, %23 : vector<1x768xf32>
    %25 = arith.mulf %15, %23 : vector<1x768xf32>
    %26 = arith.mulf %17, %23 : vector<1x768xf32>
    %cst_12 = arith.constant 0.000000e+00 : f32
    %27 = vector.broadcast %cst_12 : f32 to vector<1x768xf32>
    %28 = arith.subf %27, %6 : vector<1x768xf32>
    %29 = arith.mulf %28, %4 : vector<1x768xf32>
    %30 = arith.mulf %7, %5 : vector<1x768xf32>
    %31 = arith.subf %29, %30 : vector<1x768xf32>
    %32 = arith.subf %31, %3 : vector<1x768xf32>
    %33 = arith.mulf %4, %4 : vector<1x768xf32>
    %34 = arith.mulf %5, %5 : vector<1x768xf32>
    %35 = arith.addf %33, %34 : vector<1x768xf32>
    %36 = arith.mulf %32, %32 : vector<1x768xf32>
    %37 = arith.addf %35, %36 : vector<1x768xf32>
    %38 = math.rsqrt %37 : vector<1x768xf32>
    %39 = arith.mulf %4, %38 : vector<1x768xf32>
    %40 = arith.mulf %5, %38 : vector<1x768xf32>
    %41 = arith.mulf %32, %38 : vector<1x768xf32>
    %42 = arith.mulf %39, %24 : vector<1x768xf32>
    %43 = arith.mulf %40, %25 : vector<1x768xf32>
    %44 = arith.addf %42, %43 : vector<1x768xf32>
    %45 = arith.mulf %41, %26 : vector<1x768xf32>
    %46 = arith.addf %44, %45 : vector<1x768xf32>
    %cst_13 = arith.constant 0.751879692 : f32
    %47 = vector.broadcast %cst_13 : f32 to vector<1x768xf32>
    %48 = arith.mulf %47, %46 : vector<1x768xf32>
    %49 = arith.mulf %46, %46 : vector<1x768xf32>
    %cst_14 = arith.constant 1.000000e+00 : f32
    %50 = vector.broadcast %cst_14 : f32 to vector<1x768xf32>
    %51 = arith.subf %50, %49 : vector<1x768xf32>
    %cst_15 = arith.constant 0.565323055 : f32
    %52 = vector.broadcast %cst_15 : f32 to vector<1x768xf32>
    %53 = arith.mulf %52, %51 : vector<1x768xf32>
    %cst_16 = arith.constant 1.000000e+00 : f32
    %54 = vector.broadcast %cst_16 : f32 to vector<1x768xf32>
    %55 = arith.subf %54, %53 : vector<1x768xf32>
    %56 = math.sqrt %55 : vector<1x768xf32>
    %57 = arith.subf %48, %56 : vector<1x768xf32>
    %58 = arith.mulf %57, %39 : vector<1x768xf32>
    %cst_17 = arith.constant 0.751879692 : f32
    %59 = vector.broadcast %cst_17 : f32 to vector<1x768xf32>
    %60 = arith.mulf %59, %24 : vector<1x768xf32>
    %61 = arith.subf %58, %60 : vector<1x768xf32>
    %62 = arith.mulf %57, %40 : vector<1x768xf32>
    %cst_18 = arith.constant 0.751879692 : f32
    %63 = vector.broadcast %cst_18 : f32 to vector<1x768xf32>
    %64 = arith.mulf %63, %25 : vector<1x768xf32>
    %65 = arith.subf %62, %64 : vector<1x768xf32>
    %66 = arith.mulf %57, %41 : vector<1x768xf32>
    %cst_19 = arith.constant 0.751879692 : f32
    %67 = vector.broadcast %cst_19 : f32 to vector<1x768xf32>
    %68 = arith.mulf %67, %26 : vector<1x768xf32>
    %69 = arith.subf %66, %68 : vector<1x768xf32>
    %c0_20 = arith.constant 0 : index
    %c0_21 = arith.constant 0 : index
    %70 = vector.load %arg2[%c0_20, %c0_21] : memref<3x768xf32, #tpu.memory_space<vmem>>, vector<1x768xf32>
    %c1_22 = arith.constant 1 : index
    %c0_23 = arith.constant 0 : index
    %71 = vector.load %arg2[%c1_22, %c0_23] : memref<3x768xf32, #tpu.memory_space<vmem>>, vector<1x768xf32>
    %c2_24 = arith.constant 2 : index
    %c0_25 = arith.constant 0 : index
    %72 = vector.load %arg2[%c2_24, %c0_25] : memref<3x768xf32, #tpu.memory_space<vmem>>, vector<1x768xf32>
    %73 = arith.subf %70, %9 : vector<1x768xf32>
    %74 = arith.subf %71, %10 : vector<1x768xf32>
    %75 = arith.subf %72, %11 : vector<1x768xf32>
    %76 = arith.mulf %73, %61 : vector<1x768xf32>
    %77 = arith.mulf %74, %65 : vector<1x768xf32>
    %78 = arith.addf %76, %77 : vector<1x768xf32>
    %79 = arith.mulf %75, %69 : vector<1x768xf32>
    %80 = arith.addf %78, %79 : vector<1x768xf32>
    %81 = arith.mulf %80, %61 : vector<1x768xf32>
    %82 = arith.subf %73, %81 : vector<1x768xf32>
    %83 = arith.mulf %80, %65 : vector<1x768xf32>
    %84 = arith.subf %74, %83 : vector<1x768xf32>
    %85 = arith.mulf %80, %69 : vector<1x768xf32>
    %86 = arith.subf %75, %85 : vector<1x768xf32>
    %c0_26 = arith.constant 0 : index
    %c0_27 = arith.constant 0 : index
    %87 = vector.load %arg5[%c0_26, %c0_27] : memref<1x768xf32, #tpu.memory_space<vmem>>, vector<1x768xf32>
    %88 = arith.mulf %82, %82 : vector<1x768xf32>
    %89 = arith.mulf %84, %84 : vector<1x768xf32>
    %90 = arith.addf %88, %89 : vector<1x768xf32>
    %91 = arith.mulf %86, %86 : vector<1x768xf32>
    %92 = arith.addf %90, %91 : vector<1x768xf32>
    %93 = arith.mulf %87, %92 : vector<1x768xf32>
    %c0_28 = arith.constant 0 : index
    %c0_29 = arith.constant 0 : index
    %94 = vector.load %arg6[%c0_28, %c0_29] : memref<1x768xf32, #tpu.memory_space<vmem>>, vector<1x768xf32>
    %95 = arith.addf %94, %93 : vector<1x768xf32>
    %c0_30 = arith.constant 0 : index
    %c0_31 = arith.constant 0 : index
    %96 = vector.load %arg6[%c0_30, %c0_31] : memref<1x768xf32, #tpu.memory_space<vmem>>, vector<1x768xf32>
    tpu.vector_store %arg6[%c0_30, %c0_31], %95 {strides = array<i32>} : memref<1x768xf32, #tpu.memory_space<vmem>>, vector<1x768xf32>,
    return
  }
  func.func @transform_0(%arg0: i32, %arg1: i32) -> (i32, i32) {
    %c1_i32 = arith.constant 1 : i32
    %0 = arith.muli %arg0, %c1_i32 : i32
    %1 = arith.addi %0, %arg1 : i32
    %c0_i32 = arith.constant 0 : i32
    %c0_i32_0 = arith.constant 0 : i32
    return %c0_i32, %1 : i32, i32
  }
  func.func @transform_1(%arg0: i32, %arg1: i32) -> (i32, i32) {
    %c1_i32 = arith.constant 1 : i32
    %0 = arith.muli %arg0, %c1_i32 : i32
    %1 = arith.addi %0, %arg1 : i32
    %c0_i32 = arith.constant 0 : i32
    %c0_i32_0 = arith.constant 0 : i32
    return %c0_i32, %1 : i32, i32
  }
  func.func @transform_2(%arg0: i32, %arg1: i32) -> (i32, i32) {
    %c1_i32 = arith.constant 1 : i32
    %0 = arith.muli %arg0, %c1_i32 : i32
    %1 = arith.addi %0, %arg1 : i32
    %c0_i32 = arith.constant 0 : i32
    %c0_i32_0 = arith.constant 0 : i32
    return %c0_i32, %1 : i32, i32
  }
  func.func @transform_3(%arg0: i32, %arg1: i32) -> (i32, i32) {
    %c1_i32 = arith.constant 1 : i32
    %0 = arith.muli %arg0, %c1_i32 : i32
    %1 = arith.addi %0, %arg1 : i32
    %c0_i32 = arith.constant 0 : i32
    %c0_i32_0 = arith.constant 0 : i32
    return %c0_i32, %1 : i32, i32
  }
  func.func @transform_4(%arg0: i32, %arg1: i32) -> (i32, i32) {
    %c0_i32 = arith.constant 0 : i32
    %c0_i32_0 = arith.constant 0 : i32
    return %arg0, %c0_i32 : i32, i32
  }
}

</mosaic_0001>

<bundles_post_ra>
// kernel: tpu_custom_call.1
= control target key start
LH: loop header
LB: loop body
LE: loop exit
PB: predicated region body
PF: predicated region fallthrough
CT: control target
= control target key end

     0   :  { %9 = vsyncpa [#allocation3], 0  ;;  %s411_s0 = inlined_call_operand.hbm [shape: f32[3,768], index: 0, kind: input, shape index: {}]   ;;  %s412_s1 = inlined_call_operand.hbm [shape: f32[3,768], index: 1, kind: input, shape index: {}]   ;;  %s413_s2 = inlined_call_operand.hbm [shape: f32[3,768], index: 2, kind: input, shape index: {}]   ;;  %s414_s3 = inlined_call_operand.vmem [shape: f32[1,768], index: 3, kind: input, shape index: {}]   ;;  %s415_s4 = inlined_call_operand.hbm [shape: f32[1,768], index: 4, kind: output, shape index: {}]  }
   0x1   :  { %10 = vsyncpa [#allocation6], 0 }
   0x2   :  { %11 = vsyncpa [#allocation4], 0  ;;  %s322_s15 = smov [#allocation5]   ;;  %s323_s17 = smov [#allocation2]  }
   0x3   :  { %s36_s16 = sshll.u32 %s322_s15, 4  ;;  %s22_s18 = sshll.u32 %s323_s17, 4  ;;  %s37_s16 = int_to_ptr.vmem [resolvable:$true] %s36_s16  ;;  %s23_s18 = int_to_ptr.vmem [resolvable:$true] %s22_s18 }
   0x4   :  { %s228_s21 = scalar_lea.hbm %s412_s1, 384 }
   0x5   :  { %p229_p0 = scmp.ne.s32.totalorder %s412_s1, %s228_s21  ;;  %p232_p1 = scmp.lt.u32.totalorder %s228_s21, %s412_s1 }
   0x7   :  { %p234_p2 = pnand %p232_p1, %p229_p0 }
   0x9   :  { %237 = shalt.err (!%p234_p2)
}
   0xa   :  { %s238_s26 = scalar_lea.vmem %s37_s16, 384  ;;  %p243_p4 = scmp.lt.s32.totalorder %s37_s16, %s37_s16 }
   0xb   :  { %p239_p3 = scmp.ne.s32.totalorder %s37_s16, %s238_s26  ;;  %p244_p5 = scmp.lt.s32.totalorder %s238_s26, %s238_s26 }
   0xd   :  { %p245_p6 = por %p244_p5, %p243_p4 }
   0xf   :  { %p246_p7 = pnand %p245_p6, %p239_p3 }
  0x11   :  { %249 = shalt.err (!%p246_p7)
}
  0x12   :  { %39 = dma.hbm_to_vmem [thread:$0]  %s412_s1, 384, %s37_s16, [#allocation6]  }
  0x13   :  { %s250_s5 = scalar_lea.hbm %s411_s0, 384 }
  0x14   :  { %p251_p8 = scmp.ne.s32.totalorder %s411_s0, %s250_s5  ;;  %p254_p9 = scmp.lt.u32.totalorder %s250_s5, %s411_s0 }
  0x16   :  { %p256_p10 = pnand %p254_p9, %p251_p8 }
  0x18   :  { %259 = shalt.err (!%p256_p10)
}
  0x19   :  { %s260_s10 = scalar_lea.vmem %s23_s18, 384  ;;  %p265_p12 = scmp.lt.s32.totalorder %s23_s18, %s23_s18 }
  0x1a   :  { %p261_p11 = scmp.ne.s32.totalorder %s23_s18, %s260_s10  ;;  %p266_p13 = scmp.lt.s32.totalorder %s260_s10, %s260_s10 }
  0x1c   :  { %p267_p0 = por %p266_p13, %p265_p12 }
  0x1e   :  { %p268_p1 = pnand %p267_p0, %p261_p11 }
  0x20   :  { %271 = shalt.err (!%p268_p1)
}
  0x21   :  { %25 = dma.hbm_to_vmem [thread:$0]  %s411_s0, 384, %s23_s18, [#allocation3]  }
  0x22   :  { %s324_s12 = smov [#allocation7]   ;;  %s272_s16 = scalar_lea.hbm %s413_s2, 384 }
  0x23   :  { %s50_s13 = sshll.u32 %s324_s12, 4  ;;  %p273_p2 = scmp.ne.s32.totalorder %s413_s2, %s272_s16  ;;  %s51_s13 = int_to_ptr.vmem [resolvable:$true] %s50_s13 }
  0x24   :  { %p276_p3 = scmp.lt.u32.totalorder %s272_s16, %s413_s2 }
  0x26   :  { %p278_p4 = pnand %p276_p3, %p273_p2 }
  0x28   :  { %281 = shalt.err (!%p278_p4)
}
  0x29   :  { %s282_s22 = scalar_lea.vmem %s51_s13, 384  ;;  %p287_p6 = scmp.lt.s32.totalorder %s51_s13, %s51_s13 }
  0x2a   :  { %p283_p5 = scmp.ne.s32.totalorder %s51_s13, %s282_s22  ;;  %p288_p7 = scmp.lt.s32.totalorder %s282_s22, %s282_s22 }
  0x2c   :  { %p289_p8 = por %p288_p7, %p287_p6 }
  0x2e   :  { %p290_p9 = pnand %p289_p8, %p283_p5 }
  0x30   :  { %293 = shalt.err (!%p290_p9)
}
  0x31   :  { %53 = dma.hbm_to_vmem [thread:$0]  %s413_s2, 384, %s51_s13, [#allocation6]  }
  0x32   :  { %316 = dma.done.wait [#allocation3], 384  }
  0x33   :  { %317 = vsyncadd [#allocation3], 4294966912 }
  0x34   :  { %318 = dma.done.wait [#allocation6], 768  }
  0x35   :  { %319 = vsyncadd [#allocation6], 4294966528  ;;  %v94_v0 = vlaneseq  ;;  %v325_v2 = vmov 0.0   ;;  %v99_v3 = vld [vmem:[#allocation7] ss:$4 sm:$0x3f] }
  0x36   :  { %v101_v4 = vld [vmem:[#allocation7 + $0x1] ss:$4 sm:$0x3f]  ;;  %v103_v5 = vld [vmem:[#allocation7 + $0x2] ss:$4 sm:$0x3f] }
  0x37   :  { %vm388_vm0 = vcmp.lt.s32.totalorder %v94_v0, 768  ;;  %v104_v6 = vld [vmem:[#allocation5] ss:$4 sm:$0x3f]  ;;  %v129_v15 = vmul.f32 %v101_v4, %v101_v4  ;;  %v130_v19 = vmul.f32 %v103_v5, %v103_v5  ;;  %s326_s24 = smov [#allocation8]  }
  0x38   :  { %98 = vst.msk [vmem:[#allocation8] sm:$0x3f] %vm388_vm0, %v325_v2  ;;  %v106_v7 = vld [vmem:[#allocation5 + $0x1] ss:$4 sm:$0x3f]  ;;  %v109_v9 = vmul.f32 %v104_v6, %v99_v3  ;;  %v124_v12 = vsub.f32 0.0, %v104_v6 }
  0x39   :  { %v108_v8 = vld [vmem:[#allocation5 + $0x2] ss:$4 sm:$0x3f]  ;;  %v110_v10 = vmul.f32 %v106_v7, %v99_v3  ;;  %v126_v13 = vmul.f32 %v106_v7, %v103_v5  ;;  %v131_v26 = vadd.f32 %v130_v19, %v129_v15  ;;  %v165_v52 = vld [vmem:[#allocation2] ss:$4 sm:$0x3f] }
  0x3a   :  { %v111_v11 = vmul.f32 %v108_v8, %v99_v3  ;;  %v112_v14 = vsub.f32 0.0, %v109_v9  ;;  %v125_v18 = vmul.f32 %v124_v12, %v101_v4  ;;  %v167_v53 = vld [vmem:[#allocation2 + $0x1] ss:$4 sm:$0x3f]  ;;  %v170_v60 = vsub.f32 %v165_v52, %v109_v9  ;;  %s204_s25 = sshll.u32 %s326_s24, 4  ;;  %s205_s25 = int_to_ptr.vmem [resolvable:$true] %s204_s25 }
  0x3b   :  { %v113_v16 = vsub.f32 0.0, %v110_v10  ;;  %v169_v55 = vld [vmem:[#allocation2 + $0x2] ss:$4 sm:$0x3f]  ;;  %v171_v61 = vsub.f32 %v167_v53, %v110_v10  ;;  %s294_s26 = scalar_lea.vmem %s205_s25, 96  ;;  %p299_p11 = scmp.lt.s32.totalorder %s205_s25, %s205_s25 }
  0x3c   :  { %v114_v17 = vsub.f32 0.0, %v111_v11  ;;  %v115_v20 = vmul.f32 %v112_v14, %v112_v14  ;;  %v127_v23 = vsub.f32 %v125_v18, %v126_v13  ;;  %v172_v2 = vsub.f32 %v169_v55, %v111_v11  ;;  %v184_v11 = vld [vmem:[%s414_s3] sm:$0x3f]  ;;  %p295_p10 = scmp.ne.s32.totalorder %s205_s25, %s294_s26  ;;  %p300_p12 = scmp.lt.s32.totalorder %s294_s26, %s294_s26 }
  0x3d   :  { %v116_v21 = vmul.f32 %v113_v16, %v113_v16 }
  0x3e   :  { %v118_v22 = vmul.f32 %v114_v17, %v114_v17  ;;  %v128_v25 = vsub.f32 %v127_v23, %v99_v3  ;;  %p301_p13 = por %p300_p12, %p299_p11 }
  0x3f   :  { %v117_v24 = vadd.f32 %v116_v21, %v115_v20  ;;  %v191_v23 = vld [vmem:[#allocation8] sm:$0x3f] }
  0x40   :  { %v132_v28 = vmul.f32 %v128_v25, %v128_v25  ;;  %p302_p0 = pnand %p301_p13, %p295_p10 }
  0x41   :  { %v119_v27 = vadd.f32 %v118_v22, %v117_v24 }
  0x42   :  { %v133_v29 = vadd.f32 %v132_v28, %v131_v26 }
  0x43   :  { %222 = vrsqrt.f32 %v119_v27 }
  0x44   :  { %224 = vrsqrt.f32 %v133_v29 }
  0x4d   :  { %v223_v30 = vpop.eup %222 }
  0x4e   :  { %v121_v31 = vmul.f32 %v223_v30, %v112_v14  ;;  %v122_v32 = vmul.f32 %v223_v30, %v113_v16  ;;  %v123_v33 = vmul.f32 %v223_v30, %v114_v17  ;;  %v225_v34 = vpop.eup %224 }
  0x4f   :  { %v135_v35 = vmul.f32 %v225_v34, %v101_v4  ;;  %v136_v36 = vmul.f32 %v225_v34, %v103_v5  ;;  %v137_v37 = vmul.f32 %v225_v34, %v128_v25 }
  0x50   :  { %v157_v57 = vmul.f32 0.7518797, %v121_v31  ;;  %v160_v58 = vmul.f32 0.7518797, %v122_v32  ;;  %v163_v59 = vmul.f32 0.7518797, %v123_v33 }
  0x51   :  { %v138_v38 = vmul.f32 %v135_v35, %v121_v31  ;;  %v139_v39 = vmul.f32 %v136_v36, %v122_v32  ;;  %v141_v40 = vmul.f32 %v137_v37, %v123_v33 }
  0x53   :  { %v140_v41 = vadd.f32 %v139_v39, %v138_v38 }
  0x55   :  { %v142_v42 = vadd.f32 %v141_v40, %v140_v41 }
  0x57   :  { %v144_v43 = vmul.f32 %v142_v42, %v142_v42  ;;  %v143_v49 = vmul.f32 0.7518797, %v142_v42 }
  0x59   :  { %v145_v44 = vsub.f32 1.0, %v144_v43 }
  0x5b   :  { %v146_v45 = vmul.f32 0.56532305, %v145_v44 }
  0x5d   :  { %v147_v46 = vsub.f32 1.0, %v146_v45 }
  0x5f   :  { %226 = vrsqrt.f32 %v147_v46  ;;  %vm150_vm1 = vcmp.eq.f32.partialorder %v147_v46, inf  ;;  %v153_v48 = vand.u32 2147483648, %v147_v46  ;;  %vm152_vm2 = vcmp.eq.f32.partialorder %v147_v46, 0.0 }
  0x69   :  { %v227_v47 = vpop.eup %226 }
  0x6a   :  { %v149_v50 = vmul.f32 %v227_v47, %v147_v46 }
  0x6c   :  { %v151_v51 = vsel %vm150_vm1, %v147_v46, %v149_v50 }
  0x6d   :  { %v154_v54 = vsel %vm152_vm2, %v153_v48, %v151_v51 }
  0x6e   :  { %v155_v56 = vsub.f32 %v143_v49, %v154_v54 }
  0x70   :  { %v156_v62 = vmul.f32 %v155_v56, %v135_v35  ;;  %v159_v63 = vmul.f32 %v155_v56, %v136_v36  ;;  %v162_v0 = vmul.f32 %v155_v56, %v137_v37 }
  0x72   :  { %v158_v3 = vsub.f32 %v156_v62, %v157_v57  ;;  %v161_v4 = vsub.f32 %v159_v63, %v160_v58  ;;  %v164_v5 = vsub.f32 %v162_v0, %v163_v59 }
  0x74   :  { %v173_v6 = vmul.f32 %v170_v60, %v158_v3  ;;  %v174_v7 = vmul.f32 %v171_v61, %v161_v4  ;;  %v176_v8 = vmul.f32 %v172_v2, %v164_v5 }
  0x76   :  { %v175_v12 = vadd.f32 %v174_v7, %v173_v6 }
  0x78   :  { %v177_v13 = vadd.f32 %v176_v8, %v175_v12 }
  0x7a   :  { %v178_v14 = vmul.f32 %v177_v13, %v158_v3  ;;  %v180_v15 = vmul.f32 %v177_v13, %v161_v4  ;;  %v182_v16 = vmul.f32 %v177_v13, %v164_v5 }
  0x7c   :  { %v179_v17 = vsub.f32 %v170_v60, %v178_v14  ;;  %v181_v18 = vsub.f32 %v171_v61, %v180_v15  ;;  %v183_v19 = vsub.f32 %v172_v2, %v182_v16 }
  0x7e   :  { %v185_v9 = vmul.f32 %v179_v17, %v179_v17  ;;  %v186_v10 = vmul.f32 %v181_v18, %v181_v18  ;;  %v188_v20 = vmul.f32 %v183_v19, %v183_v19 }
  0x80   :  { %v187_v21 = vadd.f32 %v186_v10, %v185_v9 }
  0x82   :  { %v189_v22 = vadd.f32 %v188_v20, %v187_v21 }
  0x84   :  { %v190_v24 = vmul.f32 %v189_v22, %v184_v11 }
  0x86   :  { %v192_v25 = vadd.f32 %v191_v23, %v190_v24 }
  0x88   :  { %197 = vst.msk [vmem:[#allocation8] sm:$0x3f] %vm388_vm0, %v192_v25 }
  0x89   :  { %305 = shalt.err (!%p302_p0)
}
  0x8a   :  { %s306_s3 = scalar_lea.hbm %s415_s4, 96 }
  0x8b   :  { %p307_p1 = scmp.ne.s32.totalorder %s415_s4, %s306_s3  ;;  %p310_p2 = scmp.lt.u32.totalorder %s306_s3, %s415_s4 }
  0x8d   :  { %p312_p3 = pnand %p310_p2, %p307_p1 }
  0x8f   :  { %315 = shalt.err (!%p312_p3)
}
  0x90   :  { %207 = dma.vmem_to_hbm [thread:$0]  %s205_s25, 96, %s415_s4, [#allocation4]  }
  0x91   :  { %320 = dma.done.wait [#allocation4], 96  }
  0x92   :  { %321 = vsyncadd [#allocation4], 4294967200 }
  0x93   :  { %211 = vsyncpa [#allocation3], 1 }
  0x94   :  { %212 = vsyncpa [#allocation6], 1 }
  0x95   :  { %213 = vsyncpa [#allocation4], 1 }

</bundles_post_ra>
